<compile_context>
chip_gen: v5e
topology: v5e:2x2
jax: 0.10.0
libtpu: 0.0.40
codegen_flags: <defaults>
</compile_context>

<pallas_src>
import functools

import jax
import jax.numpy as jnp
from jax.experimental import pallas as pl
from jax.experimental.pallas import tpu as pltpu


def _round_up(x: int, m: int) -> int:
    return ((x + m - 1) // m) * m


def mlp_kernel(x_ref, w1_ref, b1_ref, w2_ref, b2_ref, o_ref):
    # fc1 (bf16 MXU, f32 acc) + f32 bias/ReLU + fc2 (bf16 MXU, f32 acc).
    h = jnp.dot(x_ref[...], w1_ref[...],
                preferred_element_type=jnp.float32)              # (TB, Hp) f32
    h = jnp.maximum(h + b1_ref[...], 0.0)                        # bias + ReLU
    out = jnp.dot(h.astype(jnp.bfloat16), w2_ref[...],
                  preferred_element_type=jnp.float32)            # (TB, Np) f32
    o_ref[...] = (out + b2_ref[...]).astype(o_ref.dtype)


def prepare_params(w1, b1, w2, b2, *, lane: int = 128):
    """Pad lane dims to multiples of `lane` and cast matmul operands to bf16.

    Done ONCE (not per forward call), so the weight pad/cast does not add HBM
    traffic on every inference step.  Use lane=256 on v6e/v7x for
    production-scale K/H/N (fills the 256x256 MXU); keep 128 for small shapes
    and on v5e.
    """
    K, H = w1.shape
    N = w2.shape[1]
    K_pad, H_pad, N_pad = (_round_up(d, lane) for d in (K, H, N))
    w1_p = jnp.pad(w1.astype(jnp.bfloat16), ((0, K_pad - K), (0, H_pad - H)))
    b1_p = jnp.pad(jnp.reshape(b1, (1, H)).astype(jnp.float32),
                   ((0, 0), (0, H_pad - H)))
    w2_p = jnp.pad(w2.astype(jnp.bfloat16), ((0, H_pad - H), (0, N_pad - N)))
    b2_p = jnp.pad(jnp.reshape(b2, (1, N)).astype(jnp.float32),
                   ((0, 0), (0, N_pad - N)))
    return (w1_p, b1_p, w2_p, b2_p), (K, H, N)


@functools.partial(jax.jit, static_argnames=("orig_dims", "tb"))
def mynet_forward(x, w1_p, b1_p, w2_p, b2_p, *, orig_dims, tb: int = 256):
    """x:(B,K) float; padded bf16/f32 params from prepare_params. Returns (B,N) f32."""
    K, H, N = orig_dims
    B = x.shape[0]
    K_pad, H_pad = w1_p.shape
    N_pad = w2_p.shape[1]

    # Batch tile: multiple of 16 (dense bf16 sublane packing).  Prefer >=2
    # grid steps so both v7x TensorCores get a share of the batch; for tiny
    # batches (like the demo) a single tile / grid step is unavoidable and
    # the op is overhead-bound anyway.
    if B >= 2 * tb:
        TB = tb
    elif B > 16:
        TB = _round_up(-(-B // 2), 16)
    else:
        TB = _round_up(max(B, 1), 16)
    B_pad = _round_up(B, TB)
    grid = (B_pad // TB,)

    # Only x is padded/cast per call (weights were prepared once).  Zero
    # padding is exact: padded K columns contribute 0, ReLU(0+0)=0 keeps
    # padded H columns contributing 0 to fc2, padded B/N rows/cols sliced off.
    x_p = jnp.pad(x.astype(jnp.bfloat16), ((0, B_pad - B), (0, K_pad - K)))

    # Real work / real traffic for XLA's scheduler (unpadded flops; weights
    # DMA'd once, x / out streamed once per padded tile).
    flops = 2 * B * (K * H + H * N)
    bytes_accessed = (B_pad * K_pad * 2                 # x in (bf16)
                      + K_pad * H_pad * 2 + H_pad * 4   # w1, b1 (resident, once)
                      + H_pad * N_pad * 2 + N_pad * 4   # w2, b2 (resident, once)
                      + B_pad * N_pad * 4)              # out writeback (f32)

    # Explicit scoped-VMEM budget: x / out double-buffered, weights + biases
    # single-buffered, plus the (TB, H_pad) f32 intermediate; ~50% headroom.
    # Capped at 64 MiB so it also fits v7x's physical VMEM.
    vmem_bytes = (2 * TB * K_pad * 2
                  + K_pad * H_pad * 2 + H_pad * 4
                  + H_pad * N_pad * 2 + N_pad * 4
                  + 2 * TB * N_pad * 4
                  + TB * H_pad * 4)
    vmem_limit = min(max(int(vmem_bytes * 1.5), 16 * 1024 * 1024),
                     64 * 1024 * 1024)

    # Grid-invariant operands: constant block index -> VMEM-resident; single
    # buffer (a second pipeline buffer would be pure waste).
    resident = functools.partial(pl.BlockSpec, pipeline_mode=pl.Buffered(1))

    out_pad = pl.pallas_call(
        mlp_kernel,
        out_shape=jax.ShapeDtypeStruct((B_pad, N_pad), jnp.float32),
        grid_spec=pltpu.PrefetchScalarGridSpec(
            num_scalar_prefetch=0,
            grid=grid,
            in_specs=[
                # x: batch-tiled, streamed (double-buffered) per grid step.
                pl.BlockSpec((TB, K_pad), lambda i: (i, 0)),
                # Weights / biases: resident, single-buffered.
                resident((K_pad, H_pad), lambda i: (0, 0)),
                resident((1, H_pad), lambda i: (0, 0)),
                resident((H_pad, N_pad), lambda i: (0, 0)),
                resident((1, N_pad), lambda i: (0, 0)),
            ],
            out_specs=pl.BlockSpec((TB, N_pad), lambda i: (i, 0)),
        ),
        compiler_params=pltpu.CompilerParams(
            # Batch tiles are independent -> shard across TCs on v7x.
            dimension_semantics=("parallel",),
            vmem_limit_bytes=vmem_limit,
        ),
        cost_estimate=pl.CostEstimate(
            flops=flops, transcendentals=0, bytes_accessed=bytes_accessed),
    )(x_p, w1_p, b1_p, w2_p, b2_p)

    return out_pad[:B, :N]


def init_params(key, input_size, hidden_size, num_classes):
    # Deterministic init mimicking nn.Linear's uniform(-1/sqrt(fan_in), 1/sqrt(fan_in)).
    k1, k2, k3, k4 = jax.random.split(key, 4)
    bound1 = 1.0 / jnp.sqrt(input_size)
    bound2 = 1.0 / jnp.sqrt(hidden_size)
    w1 = jax.random.uniform(k1, (input_size, hidden_size), jnp.float32, -bound1, bound1)
    b1 = jax.random.uniform(k2, (1, hidden_size), jnp.float32, -bound1, bound1)
    w2 = jax.random.uniform(k3, (hidden_size, num_classes), jnp.float32, -bound2, bound2)
    b2 = jax.random.uniform(k4, (1, num_classes), jnp.float32, -bound2, bound2)
    return w1, b1, w2, b2


if __name__ == "__main__":
    batch, input_size, hidden_size, num_classes = 8, 32, 64, 16

    key = jax.random.PRNGKey(0)
    kx, kp = jax.random.split(key)
    x = jax.random.normal(kx, (batch, input_size), jnp.float32)
    w1, b1, w2, b2 = init_params(kp, input_size, hidden_size, num_classes)

    # One-time param prep (pad + bf16 cast) hoisted out of the forward path.
    (w1_p, b1_p, w2_p, b2_p), dims = prepare_params(w1, b1, w2, b2)

    out = mynet_forward(x, w1_p, b1_p, w2_p, b2_p, orig_dims=dims)
    jax.block_until_ready(out)

    # Pure-JAX f32 reference of the same forward pass.  Kernel uses bf16 MXU
    # operands with f32 accumulation, so tolerance is loosened accordingly.
    ref = jnp.maximum(x @ w1 + b1, 0.0) @ w2 + b2
    assert out.shape == (batch, num_classes)
    assert jnp.allclose(out, ref, atol=5e-2, rtol=5e-2), (
        float(jnp.max(jnp.abs(out - ref))))

    print("KERNEL_OK")
</pallas_src>

<mosaic_0001>
module attributes {stable_mosaic.version = 11 : i64} {
  func.func @mlp_kernel(%arg0: i32, %arg1: memref<16x128xbf16, #tpu.memory_space<vmem>>, %arg2: memref<128x128xbf16, #tpu.memory_space<vmem>>, %arg3: memref<1x128xf32, #tpu.memory_space<vmem>>, %arg4: memref<128x128xbf16, #tpu.memory_space<vmem>>, %arg5: memref<1x128xf32, #tpu.memory_space<vmem>>, %arg6: memref<16x128xf32, #tpu.memory_space<vmem>>) attributes {dimension_semantics = [#tpu.dimension_semantics<parallel>], iteration_bounds = array<i64: 1>, scalar_prefetch = 0 : i64, scratch_operands = 0 : i64, tpu.core_type = #tpu.core_type<tc>, window_params = [{transform_indices = @transform_0, window_bounds = array<i64: 16, 128>}, {pipeline_mode = #tpu.pipeline_mode<synchronous>, transform_indices = @transform_1, window_bounds = array<i64: 128, 128>}, {pipeline_mode = #tpu.pipeline_mode<synchronous>, transform_indices = @transform_2, window_bounds = array<i64: 1, 128>}, {pipeline_mode = #tpu.pipeline_mode<synchronous>, transform_indices = @transform_3, window_bounds = array<i64: 128, 128>}, {pipeline_mode = #tpu.pipeline_mode<synchronous>, transform_indices = @transform_4, window_bounds = array<i64: 1, 128>}, {transform_indices = @transform_5, window_bounds = array<i64: 16, 128>}]} {
    %c0 = arith.constant 0 : index
    %c0_0 = arith.constant 0 : index
    %0 = vector.load %arg1[%c0, %c0_0] : memref<16x128xbf16, #tpu.memory_space<vmem>>, vector<16x128xbf16>
    %c0_1 = arith.constant 0 : index
    %c0_2 = arith.constant 0 : index
    %1 = vector.load %arg2[%c0_1, %c0_2] : memref<128x128xbf16, #tpu.memory_space<vmem>>, vector<128x128xbf16>
    %cst = arith.constant dense<0.000000e+00> : vector<16x128xf32>
    %2 = tpu.matmul %0, %1, %cst {dimension_numbers = #tpu.dot_dimension_numbers<[1], [0], [0], [1], [0, 0, 1, 1], [], []>} : vector<16x128xbf16>, vector<128x128xbf16>, vector<16x128xf32> -> vector<16x128xf32>
    %c0_3 = arith.constant 0 : index
    %c0_4 = arith.constant 0 : index
    %3 = vector.load %arg3[%c0_3, %c0_4] : memref<1x128xf32, #tpu.memory_space<vmem>>, vector<1x128xf32>
    %4 = vector.broadcast %3 : vector<1x128xf32> to vector<16x128xf32>
    %5 = arith.addf %2, %4 : vector<16x128xf32>
    %cst_5 = arith.constant 0.000000e+00 : f32
    %6 = vector.broadcast %cst_5 : f32 to vector<16x128xf32>
    %7 = arith.maximumf %5, %6 : vector<16x128xf32>
    %8 = arith.truncf %7 : vector<16x128xf32> to vector<16x128xbf16>
    %c0_6 = arith.constant 0 : index
    %c0_7 = arith.constant 0 : index
    %9 = vector.load %arg4[%c0_6, %c0_7] : memref<128x128xbf16, #tpu.memory_space<vmem>>, vector<128x128xbf16>
    %cst_8 = arith.constant dense<0.000000e+00> : vector<16x128xf32>
    %10 = tpu.matmul %8, %9, %cst_8 {dimension_numbers = #tpu.dot_dimension_numbers<[1], [0], [0], [1], [0, 0, 1, 1], [], []>} : vector<16x128xbf16>, vector<128x128xbf16>, vector<16x128xf32> -> vector<16x128xf32>
    %c0_9 = arith.constant 0 : index
    %c0_10 = arith.constant 0 : index
    %11 = vector.load %arg5[%c0_9, %c0_10] : memref<1x128xf32, #tpu.memory_space<vmem>>, vector<1x128xf32>
    %12 = vector.broadcast %11 : vector<1x128xf32> to vector<16x128xf32>
    %13 = arith.addf %10, %12 : vector<16x128xf32>
    %c0_11 = arith.constant 0 : index
    %c0_12 = arith.constant 0 : index
    %14 = vector.load %arg6[%c0_11, %c0_12] : memref<16x128xf32, #tpu.memory_space<vmem>>, vector<16x128xf32>
    tpu.vector_store %arg6[%c0_11, %c0_12], %13 {strides = array<i32>} : memref<16x128xf32, #tpu.memory_space<vmem>>, vector<16x128xf32>,
    return
  }
  func.func @transform_0(%arg0: i32) -> (i32, i32) {
    %c0_i32 = arith.constant 0 : i32
    %c0_i32_0 = arith.constant 0 : i32
    return %arg0, %c0_i32 : i32, i32
  }
  func.func @transform_1(%arg0: i32) -> (i32, i32) {
    %c0_i32 = arith.constant 0 : i32
    %c0_i32_0 = arith.constant 0 : i32
    %c0_i32_1 = arith.constant 0 : i32
    return %c0_i32, %c0_i32_0 : i32, i32
  }
  func.func @transform_2(%arg0: i32) -> (i32, i32) {
    %c0_i32 = arith.constant 0 : i32
    %c0_i32_0 = arith.constant 0 : i32
    %c0_i32_1 = arith.constant 0 : i32
    return %c0_i32, %c0_i32_0 : i32, i32
  }
  func.func @transform_3(%arg0: i32) -> (i32, i32) {
    %c0_i32 = arith.constant 0 : i32
    %c0_i32_0 = arith.constant 0 : i32
    %c0_i32_1 = arith.constant 0 : i32
    return %c0_i32, %c0_i32_0 : i32, i32
  }
  func.func @transform_4(%arg0: i32) -> (i32, i32) {
    %c0_i32 = arith.constant 0 : i32
    %c0_i32_0 = arith.constant 0 : i32
    %c0_i32_1 = arith.constant 0 : i32
    return %c0_i32, %c0_i32_0 : i32, i32
  }
  func.func @transform_5(%arg0: i32) -> (i32, i32) {
    %c0_i32 = arith.constant 0 : i32
    %c0_i32_0 = arith.constant 0 : i32
    return %arg0, %c0_i32 : i32, i32
  }
}

</mosaic_0001>

<bundles_post_ra>
// kernel: mynet_forward.1
= control target key start
LH: loop header
LB: loop body
LE: loop exit
PB: predicated region body
PF: predicated region fallthrough
CT: control target
= control target key end

     0   :  { %10 = vsyncpa [#allocation3], 0  ;;  %s433_s0 = inlined_call_operand.vmem [shape: bf16[16,128], index: 0, kind: input, shape index: {}]   ;;  %s434_s1 = inlined_call_operand.hbm [shape: bf16[128,128], index: 1, kind: input, shape index: {}]   ;;  %s435_s2 = inlined_call_operand.vmem [shape: f32[1,128], index: 2, kind: input, shape index: {}]   ;;  %s436_s3 = inlined_call_operand.hbm [shape: bf16[128,128], index: 3, kind: input, shape index: {}]   ;;  %s437_s4 = inlined_call_operand.vmem [shape: f32[1,128], index: 4, kind: input, shape index: {}]   ;;  %s438_s5 = inlined_call_operand.vmem [shape: f32[16,128], index: 5, kind: output, shape index: {}]  }
   0x1   :  { %s18_s20 = sshll.u32 %s434_s1, 4  ;;  %s19_s20 = int_to_ptr.hbm [resolvable:$true] %s18_s20 }
   0x2   :  { %11 = vsyncpa [#allocation5], 0  ;;  %s378_s21 = smov [#allocation2]   ;;  %s33_s25 = sshll.u32 %s436_s3, 4  ;;  %s34_s25 = int_to_ptr.hbm [resolvable:$true] %s33_s25 }
   0x3   :  { %s20_s22 = sshll.u32 %s378_s21, 4  ;;  %s379_s26 = smov 64   ;;  %s21_s22 = int_to_ptr.vmem [resolvable:$true] %s20_s22 }
   0x4   :  { %s380_s27 = smov 4   ;;  %s381_s28 = smov [#allocation4]  }
   0x5   :  { %26 = dma.hbm_to_vmem [thread:$0]  %s19_s20, 1024, %s21_s22, [#allocation3], %s379_s26, %s379_s26, %s380_s27  }
   0x6   :  { %s35_s29 = sshll.u32 %s381_s28, 4  ;;  %s36_s29 = int_to_ptr.vmem [resolvable:$true] %s35_s29 }
   0x7   :  { %41 = dma.hbm_to_vmem [thread:$0]  %s34_s25, 1024, %s36_s29, [#allocation5], %s379_s26, %s379_s26, %s380_s27  }
   0x8   :  { %374 = dma.done.wait [#allocation3], 1024  }
   0x9   :  { %375 = vsyncadd [#allocation3], 4294966272 }
   0xa   :  { %376 = dma.done.wait [#allocation5], 1024  }
   0xb   :  { %377 = vsyncadd [#allocation5], 4294966272  ;;  %v311_v0 = vld [vmem:[#allocation2 + $0x38] sm:$0xff]  ;;  %v310_v1 = vld [vmem:[#allocation2 + $0x30] sm:$0xff] }
   0xc   :  { %128 = vmatpush.bf16.msra.mxu0 %v311_v0  ;;  %v319_v2 = vld [vmem:[#allocation4 + $0x38] sm:$0xff]  ;;  %v318_v3 = vld [vmem:[#allocation4 + $0x30] sm:$0xff]  ;;  %v309_v4 = vld [vmem:[#allocation2 + $0x28] sm:$0xff] }
   0xd   :  { %213 = vmatpush.bf16.msra.mxu1 %v319_v2  ;;  %v317_v5 = vld [vmem:[#allocation4 + $0x28] sm:$0xff]  ;;  %v308_v6 = vld [vmem:[#allocation2 + $0x20] sm:$0xff]  ;;  %v307_v8 = vld [vmem:[#allocation2 + $0x18] sm:$0xff] }
   0xe   :  { %v316_v7 = vld [vmem:[#allocation4 + $0x20] sm:$0xff]  ;;  %v306_v9 = vld [vmem:[#allocation2 + $0x10] sm:$0xff]  ;;  %v305_v10 = vld [vmem:[#allocation2 + $0x8] sm:$0xff] }
   0xf   :  { %v304_v11 = vld [vmem:[#allocation2] sm:$0xff]  ;;  %v315_v13 = vld [vmem:[#allocation4 + $0x18] sm:$0xff]  ;;  %v314_v14 = vld [vmem:[#allocation4 + $0x10] sm:$0xff] }
  0x10   :  { %129 = vmatpush.bf16.msra.mxu0 %v310_v1  ;;  %v303_v12 = vld [vmem:[%s433_s0] sm:$0xff]  ;;  %v313_v15 = vld [vmem:[#allocation4 + $0x8] sm:$0xff] }
  0x11   :  { %214 = vmatpush.bf16.msra.mxu1 %v318_v3  ;;  %v312_v16 = vld [vmem:[#allocation4] sm:$0xff] }
  0x12   :  { %v324_v18 = vld [vmem:[%s435_s2] ss:$0 sm:$0xff] }
  0x13   :  { %v325_v25 = vld [vmem:[%s437_s4] ss:$0 sm:$0xff] }
  0x14   :  { %130 = vmatpush.bf16.msra.mxu0 %v309_v4 }
  0x15   :  { %215 = vmatpush.bf16.msra.mxu1 %v317_v5 }
  0x18   :  { %131 = vmatpush.bf16.msra.mxu0 %v308_v6 }
  0x19   :  { %216 = vmatpush.bf16.msra.mxu1 %v316_v7 }
  0x1c   :  { %132 = vmatpush.bf16.msra.mxu0 %v307_v8 }
  0x1d   :  { %217 = vmatpush.bf16.msra.mxu1 %v315_v13 }
  0x20   :  { %133 = vmatpush.bf16.msra.mxu0 %v306_v9 }
  0x21   :  { %218 = vmatpush.bf16.msra.mxu1 %v314_v14 }
  0x24   :  { %134 = vmatpush.bf16.msra.mxu0 %v305_v10 }
  0x25   :  { %219 = vmatpush.bf16.msra.mxu1 %v313_v15 }
  0x28   :  { %135 = vmatpush.bf16.msra.mxu0 %v304_v11 }
  0x29   :  { %220 = vmatpush.bf16.msra.mxu1 %v312_v16 }
  0x2b   :  { %136 = vmatmul.bf16.vlgmr.msra.gmra.mxu0 %v303_v12 }
  0xa8   :  { %v137_v17 = vpop.f32.mrf.mxu0 }
  0xa9   :  { %v138_v19 = vadd.f32 %v324_v18, %v137_v17 }
  0xab   :  { %v142_v22 = vmax.f32 %v138_v19, 0.0 }
  0xb0   :  { %v139_v20 = vpop.f32.mrf.mxu0 }
  0xb1   :  { %v140_v21 = vadd.f32 %v324_v18, %v139_v20 }
  0xb3   :  { %v143_v23 = vmax.f32 %v140_v21, 0.0 }
  0xb5   :  { %v144_v24 = vpack.c.bf16 %v143_v23, %v142_v22 }
  0xb7   :  { %221 = vmatmul.bf16.vlgmr.msra.gmra.mxu1 %v144_v24 }
 0x134   :  { %v222_v26 = vpop.f32.mrf.mxu1 }
 0x135   :  { %v223_v27 = vadd.f32 %v325_v25, %v222_v26 }
 0x137   :  { %227 = vst [vmem:[%s438_s5] sm:$0xff] %v223_v27 }
 0x13c   :  { %v224_v28 = vpop.f32.mrf.mxu1 }
 0x13d   :  { %v225_v29 = vadd.f32 %v325_v25, %v224_v28 }
 0x13f   :  { %228 = vst [vmem:[%s438_s5 + $0x8] sm:$0xff] %v225_v29 }
 0x140   :  { %233 = vsyncpa [#allocation3], 1 }
 0x141   :  { %234 = vsyncpa [#allocation5], 1 }

</bundles_post_ra>
